<compile_context>
chip_gen: v6e
topology: v6e:2x2x1
jax: 0.10.0
libtpu: 0.0.40
codegen_flags: <defaults>
</compile_context>

<pallas_src>
import jax
import jax.numpy as jnp
from jax import lax
from jax.experimental import pallas as pl
from jax.experimental.pallas import tpu as pltpu

# ----------------------- model hyper-params (from cfg) -----------------------
DIM_CTRL_SWITCH = 32          # config.dims.ctrl_switch   (dim_in)
DIM_SWITCH = 8                # config.dims.switch        (dim_out)
DIMS_STEM = (64, 64)          # config.switch_prior_model_dims
LEAKY_SLOPE = 0.1             # config.switch_prior_model_activations = LeakyReLU(0.1)

BATCH = 256                   # example batch (amortizes fixed overhead)
BTILE = 128                   # batch tile; multiple of 8 (f32) and 16 (bf16)

# --------------------- packed-parameter slab row layout ----------------------
LANES = 128                   # everything is zero-padded to 128 lanes
_H0, _H1 = DIMS_STEM
assert _H0 <= LANES and _H1 <= LANES and 2 * DIM_SWITCH <= LANES

W0_R0 = 0                               # (DIM_CTRL_SWITCH, LANES) : [w0 | 0]
B0_R0 = W0_R0 + DIM_CTRL_SWITCH         # (1, LANES)               : [b0 | 0]
W1_R0 = ((B0_R0 + 1 + 7) // 8) * 8      # (LANES, LANES)           : [w1 | 0; 0]
B1_R0 = W1_R0 + LANES                   # (1, LANES)               : [b1 | 0]
WH_R0 = ((B1_R0 + 1 + 7) // 8) * 8      # (LANES, LANES)           : [Wloc|Wsc|0; 0]
BH_R0 = WH_R0 + LANES                   # (1, LANES)               : [bloc|bsc|0]
N_ROWS = ((BH_R0 + 1 + 7) // 8) * 8     # pad to a multiple of 8 sublanes


# ------------------------------- Pallas kernel -------------------------------
def _switch_prior_kernel(x_ref, p_ref, out_ref):
    # Static views into the packed parameter slab (row starts are 8-aligned).
    w0 = p_ref[W0_R0:W0_R0 + DIM_CTRL_SWITCH, :]     # (32, 128)
    b0 = p_ref[B0_R0:B0_R0 + 1, :]                   # (1, 128)
    w1 = p_ref[W1_R0:W1_R0 + LANES, :]               # (128, 128)
    b1 = p_ref[B1_R0:B1_R0 + 1, :]                   # (1, 128)
    wh = p_ref[WH_R0:WH_R0 + LANES, :]               # (128, 128)  [Wloc|Wscale|0]
    bh = p_ref[BH_R0:BH_R0 + 1, :]                   # (1, 128)

    x = x_ref[...]                                   # (BTILE, 32) f32

    # --- MLP stem: Linear -> LeakyReLU(0.1), twice (bf16 MXU, f32 accum) ---
    h = jnp.dot(x.astype(jnp.bfloat16), w0.astype(jnp.bfloat16),
                preferred_element_type=jnp.float32) + b0
    h = jnp.where(h > 0, h, LEAKY_SLOPE * h)
    h = jnp.dot(h.astype(jnp.bfloat16), w1.astype(jnp.bfloat16),
                preferred_element_type=jnp.float32) + b1
    h = jnp.where(h > 0, h, LEAKY_SLOPE * h)

    # --- fused heads: lanes [0:D] = loc, [D:2D] = raw scale, rest = 0 ---
    head = jnp.dot(h.astype(jnp.bfloat16), wh.astype(jnp.bfloat16),
                   preferred_element_type=jnp.float32) + bh

    # Softplus only on the scale lanes via a mask (no cross-lane movement).
    # logaddexp(x, 0) is the numerically-stable softplus.
    # TODO(synk): the repo's DefaultScaleTransform may add a minimum-scale /
    # affine around the softplus; plain Linear->softplus is implemented here.
    col = lax.broadcasted_iota(jnp.int32, head.shape, 1)
    is_scale = (col >= DIM_SWITCH) & (col < 2 * DIM_SWITCH)
    sp = jnp.logaddexp(head, 0.0)
    out_ref[...] = jnp.where(is_scale, sp, head).astype(out_ref.dtype)


# ---------------------------------- wrapper ----------------------------------
def pack_params(p):
    """Pack all Linear weights/biases into one (N_ROWS, 128) f32 slab."""
    slab = jnp.zeros((N_ROWS, LANES), jnp.float32)
    slab = slab.at[W0_R0:W0_R0 + DIM_CTRL_SWITCH, 0:_H0].set(p["w0"])
    slab = slab.at[B0_R0, 0:_H0].set(p["b0"][0])
    slab = slab.at[W1_R0:W1_R0 + _H0, 0:_H1].set(p["w1"])
    slab = slab.at[B1_R0, 0:_H1].set(p["b1"][0])
    slab = slab.at[WH_R0:WH_R0 + _H1, 0:DIM_SWITCH].set(p["wloc"])
    slab = slab.at[WH_R0:WH_R0 + _H1, DIM_SWITCH:2 * DIM_SWITCH].set(p["wsc"])
    slab = slab.at[BH_R0, 0:DIM_SWITCH].set(p["bloc"][0])
    slab = slab.at[BH_R0, DIM_SWITCH:2 * DIM_SWITCH].set(p["bsc"][0])
    return slab


def switch_prior_forward(x, params):
    """x: (B, DIM_CTRL_SWITCH) -> (loc (B, D), scale_tril (B, D, D))."""
    B, dim_in = x.shape
    assert dim_in == DIM_CTRL_SWITCH
    assert B % BTILE == 0, "example wrapper assumes batch % BTILE == 0"

    slab = pack_params(params)

    out = pl.pallas_call(
        _switch_prior_kernel,
        out_shape=jax.ShapeDtypeStruct((B, LANES), jnp.float32),
        grid_spec=pltpu.PrefetchScalarGridSpec(
            num_scalar_prefetch=0,
            grid=(B // BTILE,),
            in_specs=[
                # batch tile of activations
                pl.BlockSpec((BTILE, DIM_CTRL_SWITCH), lambda i: (i, 0)),
                # whole parameter slab, grid-invariant -> resident in VMEM
                pl.BlockSpec((N_ROWS, LANES), lambda i: (0, 0)),
            ],
            out_specs=pl.BlockSpec((BTILE, LANES), lambda i: (i, 0)),
        ),
        compiler_params=pltpu.CompilerParams(
            dimension_semantics=("parallel",)),
    )(x, slab)

    # Glue (stays in XLA): split the lane-dense slab and embed the positive
    # diagonal into a lower-triangular scale matrix.
    loc = out[:, :DIM_SWITCH]
    scale_diag = out[:, DIM_SWITCH:2 * DIM_SWITCH]
    scale_tril = scale_diag[:, :, None] * jnp.eye(DIM_SWITCH, dtype=scale_diag.dtype)
    return loc, scale_tril


# ------------------------- pure-JAX reference (check) -------------------------
def reference_forward(x, p):
    lrelu = lambda v: jnp.where(v > 0, v, LEAKY_SLOPE * v)
    h = lrelu(x @ p["w0"] + p["b0"])
    h = lrelu(h @ p["w1"] + p["b1"])
    loc = h @ p["wloc"] + p["bloc"]
    scale = jax.nn.softplus(h @ p["wsc"] + p["bsc"])
    return loc, scale[:, :, None] * jnp.eye(DIM_SWITCH, dtype=scale.dtype)


# ----------------------------------- main ------------------------------------
def init_params(key):
    h0, h1 = DIMS_STEM
    ks = jax.random.split(key, 8)

    def lin(kw, kb, din, dout):
        bound = 1.0 / jnp.sqrt(din)
        w = jax.random.uniform(kw, (din, dout), jnp.float32, -bound, bound)
        b = jax.random.uniform(kb, (1, dout), jnp.float32, -bound, bound)
        return w, b

    w0, b0 = lin(ks[0], ks[1], DIM_CTRL_SWITCH, h0)
    w1, b1 = lin(ks[2], ks[3], h0, h1)
    wloc, bloc = lin(ks[4], ks[5], h1, DIM_SWITCH)
    wsc, bsc = lin(ks[6], ks[7], h1, DIM_SWITCH)
    return dict(w0=w0, b0=b0, w1=w1, b1=b1,
                wloc=wloc, bloc=bloc, wsc=wsc, bsc=bsc)


if __name__ == "__main__":
    key = jax.random.PRNGKey(0)
    kx, kp = jax.random.split(key)
    x = jax.random.normal(kx, (BATCH, DIM_CTRL_SWITCH), jnp.float32)
    params = init_params(kp)

    loc, scale_tril = jax.jit(switch_prior_forward)(x, params)
    jax.block_until_ready((loc, scale_tril))

    ref_loc, ref_tril = reference_forward(x, params)
    assert loc.shape == (BATCH, DIM_SWITCH)
    assert scale_tril.shape == (BATCH, DIM_SWITCH, DIM_SWITCH)
    # Kernel uses bf16 MXU operands (f32 accumulation); reference is pure f32.
    assert jnp.allclose(loc, ref_loc, atol=3e-2, rtol=3e-2)
    assert jnp.allclose(scale_tril, ref_tril, atol=3e-2, rtol=3e-2)

    print("KERNEL_OK")
</pallas_src>

<mosaic_0001>
module attributes {stable_mosaic.version = 11 : i64} {
  func.func @_switch_prior_kernel(%arg0: i32, %arg1: memref<128x32xf32, #tpu.memory_space<vmem>>, %arg2: memref<312x128xf32, #tpu.memory_space<vmem>>, %arg3: memref<128x128xf32, #tpu.memory_space<vmem>>) attributes {dimension_semantics = [#tpu.dimension_semantics<parallel>], iteration_bounds = array<i64: 2>, scalar_prefetch = 0 : i64, scratch_operands = 0 : i64, tpu.core_type = #tpu.core_type<tc>, window_params = [{transform_indices = @transform_0, window_bounds = array<i64: 128, 32>}, {pipeline_mode = #tpu.pipeline_mode<synchronous>, transform_indices = @transform_1, window_bounds = array<i64: 312, 128>}, {transform_indices = @transform_2, window_bounds = array<i64: 128, 128>}]} {
    %c0 = arith.constant 0 : index
    %c0_0 = arith.constant 0 : index
    %0 = vector.load %arg2[%c0, %c0_0] : memref<312x128xf32, #tpu.memory_space<vmem>>, vector<32x128xf32>
    %c32 = arith.constant 32 : index
    %c0_1 = arith.constant 0 : index
    %1 = vector.load %arg2[%c32, %c0_1] : memref<312x128xf32, #tpu.memory_space<vmem>>, vector<1x128xf32>
    %c40 = arith.constant 40 : index
    %c0_2 = arith.constant 0 : index
    %2 = vector.load %arg2[%c40, %c0_2] : memref<312x128xf32, #tpu.memory_space<vmem>>, vector<128x128xf32>
    %c168 = arith.constant 168 : index
    %c0_3 = arith.constant 0 : index
    %3 = vector.load %arg2[%c168, %c0_3] : memref<312x128xf32, #tpu.memory_space<vmem>>, vector<1x128xf32>
    %c176 = arith.constant 176 : index
    %c0_4 = arith.constant 0 : index
    %4 = vector.load %arg2[%c176, %c0_4] : memref<312x128xf32, #tpu.memory_space<vmem>>, vector<128x128xf32>
    %c304 = arith.constant 304 : index
    %c0_5 = arith.constant 0 : index
    %5 = vector.load %arg2[%c304, %c0_5] : memref<312x128xf32, #tpu.memory_space<vmem>>, vector<1x128xf32>
    %c0_6 = arith.constant 0 : index
    %c0_7 = arith.constant 0 : index
    %6 = vector.load %arg1[%c0_6, %c0_7] : memref<128x32xf32, #tpu.memory_space<vmem>>, vector<128x32xf32>
    %7 = arith.truncf %6 : vector<128x32xf32> to vector<128x32xbf16>
    %8 = arith.truncf %0 : vector<32x128xf32> to vector<32x128xbf16>
    %cst = arith.constant dense<0.000000e+00> : vector<128x128xf32>
    %9 = tpu.matmul %7, %8, %cst {dimension_numbers = #tpu.dot_dimension_numbers<[1], [0], [0], [1], [0, 0, 1, 1], [], []>} : vector<128x32xbf16>, vector<32x128xbf16>, vector<128x128xf32> -> vector<128x128xf32>
    %10 = vector.broadcast %1 : vector<1x128xf32> to vector<128x128xf32>
    %11 = arith.addf %9, %10 : vector<128x128xf32>
    %cst_8 = arith.constant 0.000000e+00 : f32
    %12 = vector.broadcast %cst_8 : f32 to vector<128x128xf32>
    %13 = arith.cmpf ogt, %11, %12 : vector<128x128xf32>
    %cst_9 = arith.constant 1.000000e-01 : f32
    %14 = vector.broadcast %cst_9 : f32 to vector<128x128xf32>
    %15 = arith.mulf %14, %11 : vector<128x128xf32>
    %16 = arith.select %13, %11, %15 : vector<128x128xi1>, vector<128x128xf32>
    %17 = arith.truncf %16 : vector<128x128xf32> to vector<128x128xbf16>
    %18 = arith.truncf %2 : vector<128x128xf32> to vector<128x128xbf16>
    %cst_10 = arith.constant dense<0.000000e+00> : vector<128x128xf32>
    %19 = tpu.matmul %17, %18, %cst_10 {dimension_numbers = #tpu.dot_dimension_numbers<[1], [0], [0], [1], [0, 0, 1, 1], [], []>} : vector<128x128xbf16>, vector<128x128xbf16>, vector<128x128xf32> -> vector<128x128xf32>
    %20 = vector.broadcast %3 : vector<1x128xf32> to vector<128x128xf32>
    %21 = arith.addf %19, %20 : vector<128x128xf32>
    %cst_11 = arith.constant 0.000000e+00 : f32
    %22 = vector.broadcast %cst_11 : f32 to vector<128x128xf32>
    %23 = arith.cmpf ogt, %21, %22 : vector<128x128xf32>
    %cst_12 = arith.constant 1.000000e-01 : f32
    %24 = vector.broadcast %cst_12 : f32 to vector<128x128xf32>
    %25 = arith.mulf %24, %21 : vector<128x128xf32>
    %26 = arith.select %23, %21, %25 : vector<128x128xi1>, vector<128x128xf32>
    %27 = arith.truncf %26 : vector<128x128xf32> to vector<128x128xbf16>
    %28 = arith.truncf %4 : vector<128x128xf32> to vector<128x128xbf16>
    %cst_13 = arith.constant dense<0.000000e+00> : vector<128x128xf32>
    %29 = tpu.matmul %27, %28, %cst_13 {dimension_numbers = #tpu.dot_dimension_numbers<[1], [0], [0], [1], [0, 0, 1, 1], [], []>} : vector<128x128xbf16>, vector<128x128xbf16>, vector<128x128xf32> -> vector<128x128xf32>
    %30 = vector.broadcast %5 : vector<1x128xf32> to vector<128x128xf32>
    %31 = arith.addf %29, %30 : vector<128x128xf32>
    %32 = tpu.iota {dimensions = array<i32: 1>} : vector<128x128xi32>
    %c8_i32 = arith.constant 8 : i32
    %33 = vector.broadcast %c8_i32 : i32 to vector<128x128xi32>
    %34 = arith.cmpi sge, %32, %33 : vector<128x128xi32>
    %c16_i32 = arith.constant 16 : i32
    %35 = vector.broadcast %c16_i32 : i32 to vector<128x128xi32>
    %36 = arith.cmpi slt, %32, %35 : vector<128x128xi32>
    %37 = arith.andi %34, %36 : vector<128x128xi1>
    %cst_14 = arith.constant 0.000000e+00 : f32
    %38 = vector.broadcast %cst_14 : f32 to vector<128x128xf32>
    %39 = arith.maximumf %31, %38 : vector<128x128xf32>
    %40 = vector.broadcast %cst_14 : f32 to vector<128x128xf32>
    %41 = arith.subf %31, %40 : vector<128x128xf32>
    %42 = arith.cmpf one, %41, %41 : vector<128x128xf32>
    %43 = vector.broadcast %cst_14 : f32 to vector<128x128xf32>
    %44 = arith.addf %31, %43 : vector<128x128xf32>
    %45 = math.absf %41 : vector<128x128xf32>
    %cst_15 = arith.constant 0.000000e+00 : f32
    %46 = vector.broadcast %cst_15 : f32 to vector<128x128xf32>
    %47 = arith.subf %46, %45 : vector<128x128xf32>
    %48 = math.exp %47 : vector<128x128xf32>
    %49 = math.log1p %48 : vector<128x128xf32>
    %50 = arith.addf %39, %49 : vector<128x128xf32>
    %51 = arith.select %42, %44, %50 : vector<128x128xi1>, vector<128x128xf32>
    %52 = arith.select %37, %51, %31 : vector<128x128xi1>, vector<128x128xf32>
    %c0_16 = arith.constant 0 : index
    %c0_17 = arith.constant 0 : index
    %53 = vector.load %arg3[%c0_16, %c0_17] : memref<128x128xf32, #tpu.memory_space<vmem>>, vector<128x128xf32>
    tpu.vector_store %arg3[%c0_16, %c0_17], %52 {strides = array<i32>} : memref<128x128xf32, #tpu.memory_space<vmem>>, vector<128x128xf32>,
    return
  }
  func.func @transform_0(%arg0: i32) -> (i32, i32) {
    %c0_i32 = arith.constant 0 : i32
    %c0_i32_0 = arith.constant 0 : i32
    return %arg0, %c0_i32 : i32, i32
  }
  func.func @transform_1(%arg0: i32) -> (i32, i32) {
    %c0_i32 = arith.constant 0 : i32
    %c0_i32_0 = arith.constant 0 : i32
    %c0_i32_1 = arith.constant 0 : i32
    return %c0_i32, %c0_i32_0 : i32, i32
  }
  func.func @transform_2(%arg0: i32) -> (i32, i32) {
    %c0_i32 = arith.constant 0 : i32
    %c0_i32_0 = arith.constant 0 : i32
    return %arg0, %c0_i32 : i32, i32
  }
}

</mosaic_0001>

<bundles_post_ra>
// kernel: switch_prior_forward.1
= control target key start
LH: loop header
LB: loop body
LE: loop exit
PB: predicated region body
PF: predicated region fallthrough
CT: control target
= control target key end

     0   :  { %s1293_s9 = smov 0   ;;  %s1846_s0 = inlined_call_operand.vmem [shape: f32[256,32], index: 0, kind: input, shape index: {}]   ;;  %s1847_s1 = inlined_call_operand.vmem [shape: f32[312,128], index: 1, kind: input, shape index: {}]   ;;  %s1848_s2 = inlined_call_operand.vmem [shape: f32[256,128], index: 2, kind: output, shape index: {}]  }
   0x1 LB: > { %s1050_s10 = sadd.s32 4294967295, %s1276_s9   ;;  %p1054_p0 = scmp.ge.s32.totalorder %s1276_s9, 1  ;;  %s1276_s9 = sphi %s1293_s9, %s12_s9  }
   0x2   : > { %p113_p1 = scmp.lt.s32.totalorder %s1276_s9, 3 }
   0x4   : > { %p114_p2 = pnand %p1054_p0, %p113_p1 }
   0x5   : > { %s1055_s17 = sshll.u32 (!%p114_p2), %s1050_s10, 4 }
   0x6   : > { %117 = sbr.rel (%p114_p2) target bundleno = 734 (0x2de), region = 28  ;;  %p136_p3 = scmp.lt.s32.totalorder (!%p114_p2), %s1055_s17, 31 }
   0xb   : > { %v150_v0 = vld [vmem:[%s1847_s1 + $0x10] sm:$0xff]  ;;  %v151_v1 = vld [vmem:[%s1847_s1 + $0x18] sm:$0xff]  ;;  %v148_v2 = vld [vmem:[%s1847_s1] sm:$0xff]  ;;  %s1868_s17 = smov (!%p136_p3, %s1055_s17), 31  ;;  %vm217_vm0 = vcmask 261120  }
   0xc   : > { %v212_v3 = vpack.c.bf16 %v151_v1, %v150_v0  ;;  %v149_v4 = vld [vmem:[%s1847_s1 + $0x8] sm:$0xff]  ;;  %v167_v5 = vld [vmem:[%s1847_s1 + $0x98] sm:$0xff]  ;;  %v168_v6 = vld [vmem:[%s1847_s1 + $0xa0] sm:$0xff]  ;;  %s1056_s4 = sshll.u32 %s1868_s17, 3 }
   0xd   : > { %v211_v7 = vpack.c.bf16 %v149_v4, %v148_v2  ;;  %v402_v8 = vpack.c.bf16 %v168_v6, %v167_v5  ;;  %v165_v9 = vld [vmem:[%s1847_s1 + $0x88] sm:$0xff]  ;;  %v166_v10 = vld [vmem:[%s1847_s1 + $0x90] sm:$0xff]  ;;  %v163_v12 = vld [vmem:[%s1847_s1 + $0x78] sm:$0xff]  ;;  %s1339_s7 = scalar_lea.vmem %s1846_s0, %s1056_s4  ;;  %s1620_s20 = scalar_lea.vmem %s1848_s2, %s1056_s4 }
   0xe   : > { %1114 = vmatprep.subr.bf16.mxu0 %v212_v3  ;;  %v401_v11 = vpack.c.bf16 %v166_v10, %v165_v9  ;;  %v164_v13 = vld [vmem:[%s1847_s1 + $0x80] sm:$0xff]  ;;  %v161_v15 = vld [vmem:[%s1847_s1 + $0x68] sm:$0xff]  ;;  %v162_v16 = vld [vmem:[%s1847_s1 + $0x70] sm:$0xff] }
   0xf   : > { %1115 = vmatpush3.bf16.msra.mxu0 %v212_v3  ;;  %1134 = vmatprep.subr.bf16.mxu1 %v402_v8  ;;  %v400_v14 = vpack.c.bf16 %v164_v13, %v163_v12  ;;  %v187_v17 = vld [vmem:[%s1339_s7] sm:$0xff]  ;;  %v188_v18 = vld [vmem:[%s1339_s7 + $0x8] sm:$0xff]  ;;  %v189_v19 = vld [vmem:[%s1339_s7 + $0x10] sm:$0xff]  ;;  %v399_v26 = vpack.c.bf16 %v162_v16, %v161_v15 }
  0x10   : > { %1116 = vmatprep.subr.bf16.mxu0 %v211_v7  ;;  %1135 = vmatpush3.bf16.msra.mxu1 %v402_v8  ;;  %v203_v20 = vpack.c.bf16 %v188_v18, %v187_v17  ;;  %v190_v21 = vld [vmem:[%s1339_s7 + $0x18] sm:$0xff]  ;;  %v191_v22 = vld [vmem:[%s1339_s7 + $0x20] sm:$0xff]  ;;  %v192_v23 = vld [vmem:[%s1339_s7 + $0x28] sm:$0xff] }
  0x11   : > { %1136 = vmatprep.subr.bf16.mxu1 %v401_v11  ;;  %v204_v24 = vpack.c.bf16 %v190_v21, %v189_v19  ;;  %v205_v25 = vpack.c.bf16 %v192_v23, %v191_v22  ;;  %v159_v27 = vld [vmem:[%s1847_s1 + $0x58] sm:$0xff]  ;;  %v160_v28 = vld [vmem:[%s1847_s1 + $0x60] sm:$0xff]  ;;  %v193_v29 = vld [vmem:[%s1339_s7 + $0x30] sm:$0xff] }
  0x12   : > { %1118 = vmatprep.mubr.msk.bf16.mxu0 %vm217_vm0, %v203_v20  ;;  %v194_v30 = vld [vmem:[%s1339_s7 + $0x38] sm:$0xff]  ;;  %v195_v31 = vld [vmem:[%s1339_s7 + $0x40] sm:$0xff]  ;;  %v196_v32 = vld [vmem:[%s1339_s7 + $0x48] sm:$0xff]  ;;  %v398_v33 = vpack.c.bf16 %v160_v28, %v159_v27 }
  0x13   : > { %1117 = vmatpush3.bf16.msra.mxu0 %v211_v7  ;;  %v206_v34 = vpack.c.bf16 %v194_v30, %v193_v29  ;;  %v207_v35 = vpack.c.bf16 %v196_v32, %v195_v31  ;;  %v197_v36 = vld [vmem:[%s1339_s7 + $0x50] sm:$0xff]  ;;  %v198_v37 = vld [vmem:[%s1339_s7 + $0x58] sm:$0xff]  ;;  %v199_v38 = vld [vmem:[%s1339_s7 + $0x60] sm:$0xff] }
  0x14   : > { %1137 = vmatpush3.bf16.msra.mxu1 %v401_v11  ;;  %v200_v39 = vld [vmem:[%s1339_s7 + $0x68] sm:$0xff]  ;;  %v208_v40 = vpack.c.bf16 %v198_v37, %v197_v36  ;;  %v201_v42 = vld [vmem:[%s1339_s7 + $0x70] sm:$0xff]  ;;  %v202_v43 = vld [vmem:[%s1339_s7 + $0x78] sm:$0xff] }
  0x15   : > { %1138 = vmatprep.subr.bf16.mxu1 %v400_v14  ;;  %v209_v41 = vpack.c.bf16 %v200_v39, %v199_v38  ;;  %v210_v44 = vpack.c.bf16 %v202_v43, %v201_v42  ;;  %v157_v45 = vld [vmem:[%s1847_s1 + $0x48] sm:$0xff]  ;;  %v158_v46 = vld [vmem:[%s1847_s1 + $0x50] sm:$0xff]  ;;  %v155_v48 = vld [vmem:[%s1847_s1 + $0x38] sm:$0xff] }
  0x16   : > { %1119 = vmatmul.mubr.msk.bf16.vlgmr.msra.gmra.mxu0 %vm217_vm0, %v204_v24  ;;  %v397_v47 = vpack.c.bf16 %v158_v46, %v157_v45  ;;  %v156_v49 = vld [vmem:[%s1847_s1 + $0x40] sm:$0xff]  ;;  %v153_v51 = vld [vmem:[%s1847_s1 + $0x28] sm:$0xff]  ;;  %v154_v52 = vld [vmem:[%s1847_s1 + $0x30] sm:$0xff] }
  0x17   : > { %1122 = vmatprep.mubr.msk.bf16.mxu0 %vm217_vm0, %v205_v25  ;;  %v396_v50 = vpack.c.bf16 %v156_v49, %v155_v48  ;;  %v395_v53 = vpack.c.bf16 %v154_v52, %v153_v51  ;;  %v184_v54 = vld [vmem:[%s1847_s1 + $0x120] sm:$0xff]  ;;  %v185_v55 = vld [vmem:[%s1847_s1 + $0x128] sm:$0xff]  ;;  %v182_v56 = vld [vmem:[%s1847_s1 + $0x110] sm:$0xff] }
  0x18   : > { %1139 = vmatpush3.bf16.msra.mxu1 %v400_v14  ;;  %v567_v57 = vpack.c.bf16 %v185_v55, %v184_v54  ;;  %v183_v58 = vld [vmem:[%s1847_s1 + $0x118] sm:$0xff]  ;;  %v180_v60 = vld [vmem:[%s1847_s1 + $0x100] sm:$0xff]  ;;  %v181_v61 = vld [vmem:[%s1847_s1 + $0x108] sm:$0xff] }
  0x19   : > { %1140 = vmatprep.subr.bf16.mxu1 %v399_v26  ;;  %v566_v59 = vpack.c.bf16 %v183_v58, %v182_v56  ;;  %v565_v62 = vpack.c.bf16 %v181_v61, %v180_v60  ;;  %v178_v63 = vld [vmem:[%s1847_s1 + $0xf0] sm:$0xff]  ;;  %v179_v0 = vld [vmem:[%s1847_s1 + $0xf8] sm:$0xff]  ;;  %v176_v2 = vld [vmem:[%s1847_s1 + $0xe0] sm:$0xff] }
  0x1a   : > { %1166 = vmatprep.subr.bf16.mxu0 %v567_v57  ;;  %v564_v1 = vpack.c.bf16 %v179_v0, %v178_v63  ;;  %v177_v3 = vld [vmem:[%s1847_s1 + $0xe8] sm:$0xff]  ;;  %v1428_v6 = vld [vmem:[%s1847_s1 + $0x20] ss:$0 sm:$0xff] }
  0x1b   : > { %1167 = vmatpush3.bf16.msra.mxu0 %v567_v57  ;;  %v563_v4 = vpack.c.bf16 %v177_v3, %v176_v2 }
  0x1c   : > { %1141 = vmatpush3.bf16.msra.mxu1 %v399_v26  ;;  %1168 = vmatprep.subr.bf16.mxu0 %v566_v59 }
  0x1d   : > { %1142 = vmatprep.subr.bf16.mxu1 %v398_v33 }
  0x1e   : > { %1123 = vmatmul.mubr.msk.bf16.gmra.mxu0 %vm217_vm0, %v206_v34 }
  0x1f   : > { %1126 = vmatprep.mubr.msk.bf16.mxu0 %vm217_vm0, %v207_v35  ;;  %1169 = vmatpush3.bf16.msra.mxu0 %v566_v59 }
  0x20   : > { %1143 = vmatpush3.bf16.msra.mxu1 %v398_v33  ;;  %1170 = vmatprep.subr.bf16.mxu0 %v565_v62 }
  0x21   : > { %1144 = vmatprep.subr.bf16.mxu1 %v397_v47 }
  0x23   : > { %1171 = vmatpush3.bf16.msra.mxu0 %v565_v62 }
  0x24   : > { %1145 = vmatpush3.bf16.msra.mxu1 %v397_v47  ;;  %1172 = vmatprep.subr.bf16.mxu0 %v564_v1 }
  0x25   : > { %1146 = vmatprep.subr.bf16.mxu1 %v396_v50 }
  0x26   : > { %1127 = vmatmul.mubr.msk.bf16.gmra.mxu0 %vm217_vm0, %v208_v40 }
  0x27   : > { %1130 = vmatprep.mubr.msk.bf16.mxu0 %vm217_vm0, %v209_v41  ;;  %1173 = vmatpush3.bf16.msra.mxu0 %v564_v1 }
  0x28   : > { %1147 = vmatpush3.bf16.msra.mxu1 %v396_v50  ;;  %1174 = vmatprep.subr.bf16.mxu0 %v563_v4 }
  0x29   : > { %1148 = vmatprep.subr.bf16.mxu1 %v395_v53 }
  0x2b   : > { %1175 = vmatpush3.bf16.msra.mxu0 %v563_v4 }
  0x2c   : > { %1149 = vmatpush3.bf16.msra.mxu1 %v395_v53 }
  0x2e   : > { %1131 = vmatmul.mubr.msk.bf16.gmra.mxu0 %vm217_vm0, %v210_v44 }
  0xd6   : > { %v1120_v5 = vpop.f32.mrf.mxu0 }
  0xd7   : > { %v285_v9 = vadd.f32 %v1120_v5, %v1428_v6 }
  0xd8   : > { %v276_v7 = vpop.f32.mrf.mxu0 }
  0xd9   : > { %v277_v8 = vadd.f32 %v1428_v6, %v276_v7  ;;  %v357_v16 = vmul.f32 0.1, %v285_v9  ;;  %vm341_vm3 = vcmp.gt.f32.partialorder %v285_v9, 0.0 }
  0xda   : > { %v1121_v10 = vpop.f32.mrf.mxu0 }
  0xdb   : > { %v288_v11 = vadd.f32 %v1121_v10, %v1428_v6  ;;  %v355_v13 = vmul.f32 0.1, %v277_v8  ;;  %vm339_vm2 = vcmp.gt.f32.partialorder %v277_v8, 0.0  ;;  %v373_v27 = vsel %vm341_vm3, %v285_v9, %v357_v16 }
  0xdc   : > { %v279_v12 = vpop.f32.mrf.mxu0 }
  0xdd   : > { %vm342_vm1 = vcmp.gt.f32.partialorder %v288_v11, 0.0  ;;  %v358_v14 = vmul.f32 0.1, %v288_v11  ;;  %v280_v15 = vadd.f32 %v1428_v6, %v279_v12  ;;  %v371_v22 = vsel %vm339_vm2, %v277_v8, %v355_v13 }
  0xde   : > { %v1124_v17 = vpop.f32.mrf.mxu0 }
  0xdf   : > { %v356_v18 = vmul.f32 0.1, %v280_v15  ;;  %vm340_vm4 = vcmp.gt.f32.partialorder %v280_v15, 0.0  ;;  %v374_v20 = vsel %vm342_vm1, %v288_v11, %v358_v14  ;;  %v301_v24 = vadd.f32 %v1124_v17, %v1428_v6  ;;  %v172_v17 = vld [vmem:[%s1847_s1 + $0xc0] sm:$0xff] }
  0xe0   : > { %v292_v19 = vpop.f32.mrf.mxu0  ;;  %v388_v29 = vpack.c.bf16 %v374_v20, %v373_v27  ;;  %v170_v20 = vld [vmem:[%s1847_s1 + $0xb0] sm:$0xff] }
  0xe1   : > { %v293_v21 = vadd.f32 %v1428_v6, %v292_v19  ;;  %v372_v23 = vsel %vm340_vm4, %v280_v15, %v356_v18  ;;  %v361_v34 = vmul.f32 0.1, %v301_v24  ;;  %vm345_vm7 = vcmp.gt.f32.partialorder %v301_v24, 0.0  ;;  %v174_v15 = vld [vmem:[%s1847_s1 + $0xd0] sm:$0xff]  ;;  %v173_v18 = vld [vmem:[%s1847_s1 + $0xc8] sm:$0xff] }
  0xe2   : > { %v1125_v25 = vpop.f32.mrf.mxu0  ;;  %v387_v26 = vpack.c.bf16 %v372_v23, %v371_v22  ;;  %v561_v19 = vpack.c.bf16 %v173_v18, %v172_v17 }
  0xe3   : > { %v304_v28 = vadd.f32 %v1125_v25, %v1428_v6  ;;  %v359_v31 = vmul.f32 0.1, %v293_v21  ;;  %vm343_vm6 = vcmp.gt.f32.partialorder %v293_v21, 0.0  ;;  %v377_v45 = vsel %vm345_vm7, %v301_v24, %v361_v34  ;;  %v1467_v24 = vld [vmem:[%s1847_s1 + $0xa8] ss:$0 sm:$0xff] }
  0xe4   : > { %v295_v30 = vpop.f32.mrf.mxu0  ;;  %1150 = vmatprep.mubr.bf16.mxu1 %v387_v26 }
  0xe5   : > { %vm346_vm5 = vcmp.gt.f32.partialorder %v304_v28, 0.0  ;;  %v362_v32 = vmul.f32 0.1, %v304_v28  ;;  %v296_v33 = vadd.f32 %v1428_v6, %v295_v30  ;;  %1151 = vmatmul.mubr.bf16.vlgmr.msra.gmra.mxu1 %v388_v29  ;;  %v375_v40 = vsel %vm343_vm6, %v293_v21, %v359_v31  ;;  %v171_v21 = vld [vmem:[%s1847_s1 + $0xb8] sm:$0xff] }
  0xe6   : > { %v1128_v35 = vpop.f32.mrf.mxu0  ;;  %v560_v22 = vpack.c.bf16 %v171_v21, %v170_v20 }
  0xe7   : > { %vm344_vm8 = vcmp.gt.f32.partialorder %v296_v33, 0.0  ;;  %v360_v36 = vmul.f32 0.1, %v296_v33  ;;  %v378_v38 = vsel %vm346_vm5, %v304_v28, %v362_v32  ;;  %v317_v42 = vadd.f32 %v1128_v35, %v1428_v6 }
  0xe8   : > { %v308_v37 = vpop.f32.mrf.mxu0  ;;  %v390_v47 = vpack.c.bf16 %v378_v38, %v377_v45 }
  0xe9   : > { %v309_v39 = vadd.f32 %v1428_v6, %v308_v37  ;;  %v376_v41 = vsel %vm344_vm8, %v296_v33, %v360_v36  ;;  %v365_v52 = vmul.f32 0.1, %v317_v42  ;;  %vm349_vm11 = vcmp.gt.f32.partialorder %v317_v42, 0.0 }
  0xea   : > { %v1129_v43 = vpop.f32.mrf.mxu0  ;;  %v389_v44 = vpack.c.bf16 %v376_v41, %v375_v40 }
  0xeb   : > { %v320_v46 = vadd.f32 %v1129_v43, %v1428_v6  ;;  %v363_v49 = vmul.f32 0.1, %v309_v39  ;;  %vm347_vm10 = vcmp.gt.f32.partialorder %v309_v39, 0.0  ;;  %v381_v63 = vsel %vm349_vm11, %v317_v42, %v365_v52 }
  0xec   : > { %v311_v48 = vpop.f32.mrf.mxu0  ;;  %1154 = vmatprep.mubr.bf16.mxu1 %v389_v44 }
  0xed   : > { %vm350_vm9 = vcmp.gt.f32.partialorder %v320_v46, 0.0  ;;  %v366_v50 = vmul.f32 0.1, %v320_v46  ;;  %v312_v51 = vadd.f32 %v1428_v6, %v311_v48  ;;  %1155 = vmatmul.mubr.bf16.gmra.mxu1 %v390_v47  ;;  %v379_v58 = vsel %vm347_vm10, %v309_v39, %v363_v49 }
  0xee   : > { %v1132_v53 = vpop.f32.mrf.mxu0 }
  0xef   : > { %vm348_vm12 = vcmp.gt.f32.partialorder %v312_v51, 0.0  ;;  %v364_v54 = vmul.f32 0.1, %v312_v51  ;;  %v382_v56 = vsel %vm350_vm9, %v320_v46, %v366_v50  ;;  %v333_v60 = vadd.f32 %v1132_v53, %v1428_v6 }
  0xf0   : > { %v324_v55 = vpop.f32.mrf.mxu0  ;;  %v392_v1 = vpack.c.bf16 %v382_v56, %v381_v63 }
  0xf1   : > { %v325_v57 = vadd.f32 %v1428_v6, %v324_v55  ;;  %v380_v59 = vsel %vm348_vm12, %v312_v51, %v364_v54  ;;  %v369_v7 = vmul.f32 0.1, %v333_v60  ;;  %vm353_vm15 = vcmp.gt.f32.partialorder %v333_v60, 0.0 }
  0xf2   : > { %v1133_v61 = vpop.f32.mrf.mxu0  ;;  %v391_v62 = vpack.c.bf16 %v380_v59, %v379_v58 }
  0xf3   : > { %v336_v0 = vadd.f32 %v1133_v61, %v1428_v6  ;;  %v367_v3 = vmul.f32 0.1, %v325_v57  ;;  %vm351_vm14 = vcmp.gt.f32.partialorder %v325_v57, 0.0  ;;  %v385_v13 = vsel %vm353_vm15, %v333_v60, %v369_v7 }
  0xf4   : > { %v327_v2 = vpop.f32.mrf.mxu0  ;;  %1158 = vmatprep.mubr.bf16.mxu1 %v391_v62 }
  0xf5   : > { %vm354_vm13 = vcmp.gt.f32.partialorder %v336_v0, 0.0  ;;  %v370_v4 = vmul.f32 0.1, %v336_v0  ;;  %v328_v5 = vadd.f32 %v1428_v6, %v327_v2  ;;  %1159 = vmatmul.mubr.bf16.gmra.mxu1 %v392_v1  ;;  %v383_v10 = vsel %vm351_vm14, %v325_v57, %v367_v3  ;;  %v175_v6 = vld [vmem:[%s1847_s1 + $0xd8] sm:$0xff] }
  0xf6   : > { %v562_v16 = vpack.c.bf16 %v175_v6, %v174_v15 }
  0xf7   : > { %vm352_vm0 = vcmp.gt.f32.partialorder %v328_v5, 0.0  ;;  %v368_v8 = vmul.f32 0.1, %v328_v5  ;;  %v386_v9 = vsel %vm354_vm13, %v336_v0, %v370_v4 }
  0xf8   : > { %v394_v14 = vpack.c.bf16 %v386_v9, %v385_v13  ;;  %1176 = vmatprep.subr.bf16.mxu0 %v562_v16 }
  0xf9   : > { %v384_v11 = vsel %vm352_vm0, %v328_v5, %v368_v8  ;;  %1177 = vmatpush3.bf16.msra.mxu0 %v562_v16 }
  0xfa   : > { %v393_v12 = vpack.c.bf16 %v384_v11, %v383_v10  ;;  %1178 = vmatprep.subr.bf16.mxu0 %v561_v19 }
  0xfc   : > { %1162 = vmatprep.mubr.bf16.mxu1 %v393_v12 }
  0xfd   : > { %1163 = vmatmul.mubr.bf16.gmra.mxu1 %v394_v14  ;;  %1179 = vmatpush3.bf16.msra.mxu0 %v561_v19 }
  0xfe   : > { %1180 = vmatprep.subr.bf16.mxu0 %v560_v22 }
 0x101   : > { %1181 = vmatpush3.bf16.msra.mxu0 %v560_v22 }
 0x1a5   : > { %v1152_v23 = vpop.f32.mrf.mxu1 }
 0x1a6   : > { %v450_v27 = vadd.f32 %v1152_v23, %v1467_v24 }
 0x1a7   : > { %v441_v25 = vpop.f32.mrf.mxu1 }
 0x1a8   : > { %v442_v26 = vadd.f32 %v1467_v24, %v441_v25  ;;  %v522_v34 = vmul.f32 0.1, %v450_v27  ;;  %vm506_vm3 = vcmp.gt.f32.partialorder %v450_v27, 0.0 }
 0x1a9   : > { %v1153_v28 = vpop.f32.mrf.mxu1 }
 0x1aa   : > { %v453_v29 = vadd.f32 %v1153_v28, %v1467_v24  ;;  %v520_v31 = vmul.f32 0.1, %v442_v26  ;;  %vm504_vm2 = vcmp.gt.f32.partialorder %v442_v26, 0.0  ;;  %v538_v42 = vsel %vm506_vm3, %v450_v27, %v522_v34 }
 0x1ab   : > { %v444_v30 = vpop.f32.mrf.mxu1 }
 0x1ac   : > { %vm507_vm1 = vcmp.gt.f32.partialorder %v453_v29, 0.0  ;;  %v523_v32 = vmul.f32 0.1, %v453_v29  ;;  %v445_v33 = vadd.f32 %v1467_v24, %v444_v30  ;;  %v536_v40 = vsel %vm504_vm2, %v442_v26, %v520_v31 }
 0x1ad   : > { %v1156_v35 = vpop.f32.mrf.mxu1 }
 0x1ae   : > { %vm505_vm4 = vcmp.gt.f32.partialorder %v445_v33, 0.0  ;;  %v521_v36 = vmul.f32 0.1, %v445_v33  ;;  %v539_v37 = vsel %vm507_vm1, %v453_v29, %v523_v32  ;;  %v466_v43 = vadd.f32 %v1156_v35, %v1467_v24 }
 0x1af   : > { %v457_v38 = vpop.f32.mrf.mxu1  ;;  %v553_v46 = vpack.c.bf16 %v539_v37, %v538_v42 }
 0x1b0   : > { %v458_v39 = vadd.f32 %v1467_v24, %v457_v38  ;;  %v537_v41 = vsel %vm505_vm4, %v445_v33, %v521_v36  ;;  %v526_v52 = vmul.f32 0.1, %v466_v43  ;;  %vm510_vm7 = vcmp.gt.f32.partialorder %v466_v43, 0.0  ;;  %v1488_v33 = vld [vmem:[%s1847_s1 + $0x130] ss:$0 sm:$0xff] }
 0x1b1   : > { %v1157_v44 = vpop.f32.mrf.mxu1  ;;  %v552_v45 = vpack.c.bf16 %v537_v41, %v536_v40 }
 0x1b2   : > { %v469_v47 = vadd.f32 %v1157_v44, %v1467_v24  ;;  %v524_v49 = vmul.f32 0.1, %v458_v39  ;;  %vm508_vm6 = vcmp.gt.f32.partialorder %v458_v39, 0.0  ;;  %v542_v63 = vsel %vm510_vm7, %v466_v43, %v526_v52 }
 0x1b3   : > { %v460_v48 = vpop.f32.mrf.mxu1  ;;  %1182 = vmatprep.mubr.bf16.mxu0 %v552_v45 }
 0x1b4   : > { %vm511_vm5 = vcmp.gt.f32.partialorder %v469_v47, 0.0  ;;  %v527_v50 = vmul.f32 0.1, %v469_v47  ;;  %v461_v51 = vadd.f32 %v1467_v24, %v460_v48  ;;  %1183 = vmatmul.mubr.bf16.vlgmr.msra.gmra.mxu0 %v553_v46  ;;  %v540_v58 = vsel %vm508_vm6, %v458_v39, %v524_v49 }
 0x1b5   : > { %v1160_v53 = vpop.f32.mrf.mxu1 }
 0x1b6   : > { %vm509_vm8 = vcmp.gt.f32.partialorder %v461_v51, 0.0  ;;  %v525_v54 = vmul.f32 0.1, %v461_v51  ;;  %v543_v56 = vsel %vm511_vm5, %v469_v47, %v527_v50  ;;  %v482_v60 = vadd.f32 %v1160_v53, %v1467_v24 }
 0x1b7   : > { %v473_v55 = vpop.f32.mrf.mxu1  ;;  %v555_v1 = vpack.c.bf16 %v543_v56, %v542_v63 }
 0x1b8   : > { %v474_v57 = vadd.f32 %v1467_v24, %v473_v55  ;;  %v541_v59 = vsel %vm509_vm8, %v461_v51, %v525_v54  ;;  %v530_v7 = vmul.f32 0.1, %v482_v60  ;;  %vm514_vm11 = vcmp.gt.f32.partialorder %v482_v60, 0.0 }
 0x1b9   : > { %v1161_v61 = vpop.f32.mrf.mxu1  ;;  %v554_v62 = vpack.c.bf16 %v541_v59, %v540_v58 }
 0x1ba   : > { %v485_v0 = vadd.f32 %v1161_v61, %v1467_v24  ;;  %v528_v3 = vmul.f32 0.1, %v474_v57  ;;  %vm512_vm10 = vcmp.gt.f32.partialorder %v474_v57, 0.0  ;;  %v546_v17 = vsel %vm514_vm11, %v482_v60, %v530_v7 }
 0x1bb   : > { %v476_v2 = vpop.f32.mrf.mxu1  ;;  %1186 = vmatprep.mubr.bf16.mxu0 %v554_v62 }
 0x1bc   : > { %vm515_vm9 = vcmp.gt.f32.partialorder %v485_v0, 0.0  ;;  %v531_v4 = vmul.f32 0.1, %v485_v0  ;;  %v477_v5 = vadd.f32 %v1467_v24, %v476_v2  ;;  %1187 = vmatmul.mubr.bf16.gmra.mxu0 %v555_v1  ;;  %v544_v13 = vsel %vm512_vm10, %v474_v57, %v528_v3 }
 0x1bd   : > { %v1164_v8 = vpop.f32.mrf.mxu1 }
 0x1be   : > { %vm513_vm12 = vcmp.gt.f32.partialorder %v477_v5, 0.0  ;;  %v529_v9 = vmul.f32 0.1, %v477_v5  ;;  %v547_v11 = vsel %vm515_vm9, %v485_v0, %v531_v4  ;;  %v498_v15 = vadd.f32 %v1164_v8, %v1467_v24 }
 0x1bf   : > { %v489_v10 = vpop.f32.mrf.mxu1  ;;  %v557_v19 = vpack.c.bf16 %v547_v11, %v546_v17  ;;  %v669_v17 = vlaneseq }
 0x1c0   : > { %v490_v12 = vadd.f32 %v1467_v24, %v489_v10  ;;  %v545_v14 = vsel %vm513_vm12, %v477_v5, %v529_v9  ;;  %v534_v25 = vmul.f32 0.1, %v498_v15  ;;  %vm518_vm15 = vcmp.gt.f32.partialorder %v498_v15, 0.0 }
 0x1c1   : > { %v1165_v6 = vpop.f32.mrf.mxu1  ;;  %v556_v16 = vpack.c.bf16 %v545_v14, %v544_v13 }
 0x1c2   : > { %v501_v18 = vadd.f32 %v1165_v6, %v1467_v24  ;;  %v532_v21 = vmul.f32 0.1, %v490_v12  ;;  %vm516_vm14 = vcmp.gt.f32.partialorder %v490_v12, 0.0  ;;  %v550_v31 = vsel %vm518_vm15, %v498_v15, %v534_v25 }
 0x1c3   : > { %v492_v20 = vpop.f32.mrf.mxu1  ;;  %1190 = vmatprep.mubr.bf16.mxu0 %v556_v16 }
 0x1c4   : > { %vm519_vm13 = vcmp.gt.f32.partialorder %v501_v18, 0.0  ;;  %v535_v22 = vmul.f32 0.1, %v501_v18  ;;  %v493_v23 = vadd.f32 %v1467_v24, %v492_v20  ;;  %1191 = vmatmul.mubr.bf16.gmra.mxu0 %v557_v19  ;;  %v548_v28 = vsel %vm516_vm14, %v490_v12, %v532_v21 }
 0x1c6   : > { %vm517_vm0 = vcmp.gt.f32.partialorder %v493_v23, 0.0  ;;  %v533_v26 = vmul.f32 0.1, %v493_v23  ;;  %v551_v27 = vsel %vm519_vm13, %v501_v18, %v535_v22 }
 0x1c7   : > { %v559_v32 = vpack.c.bf16 %v551_v27, %v550_v31  ;;  %v1535_v27 = vand.u32 127, %v669_v17 }
 0x1c8   : > { %v549_v29 = vsel %vm517_vm0, %v493_v23, %v533_v26 }
 0x1c9   : > { %v558_v30 = vpack.c.bf16 %v549_v29, %v548_v28  ;;  %vm671_vm1 = vcmp.ge.s32.totalorder %v1535_v27, 8  ;;  %vm672_vm2 = vcmp.lt.s32.totalorder %v1535_v27, 16 }
 0x1ca   : > { %vm1603_vm10 = vmand %vm671_vm1, %vm672_vm2 }
 0x1cb   : > { %1194 = vmatprep.mubr.bf16.mxu0 %v558_v30 }
 0x1cc   : > { %1195 = vmatmul.mubr.bf16.gmra.mxu0 %v559_v32 }
 0x274   : > { %v1184_v24 = vpop.f32.mrf.mxu0 }
 0x275   : > { %v1491_v34 = vadd.f32 %v1184_v24, %v1488_v33 }
 0x276   : > { %v606_v35 = vpop.f32.mrf.mxu0 }
 0x277   : > { %v724_v36 = vand.u32 2147483647, %v1491_v34  ;;  %v1495_v37 = vadd.f32 %v1488_v33, %v606_v35  ;;  %v676_v30 = vmax.f32 %v1491_v34, 0.0  ;;  %vm692_vm4 = vcmp.ne.f32.partialorder %v1491_v34, %v1491_v34 }
 0x278   : > { %v1185_v38 = vpop.f32.mrf.mxu0 }
 0x279   : > { %v740_v39 = vsub.f32 0.0, %v724_v36  ;;  %v722_v40 = vand.u32 2147483647, %v1495_v37  ;;  %v1499_v41 = vadd.f32 %v1185_v38, %v1488_v33  ;;  %v674_v31 = vmax.f32 %v1495_v37, 0.0 }
 0x27a   : > { %v609_v42 = vpop.f32.mrf.mxu0  ;;  %vm690_vm6 = vcmp.ne.f32.partialorder %v1495_v37, %v1495_v37 }
 0x27b   : > { %v758_v43 = vmul.f32 1.442695, %v740_v39  ;;  %v738_v44 = vsub.f32 0.0, %v722_v40  ;;  %v1502_v45 = vadd.f32 %v1488_v33, %v609_v42  ;;  %v725_v46 = vand.u32 2147483647, %v1499_v41 }
 0x27c   : > { %v1188_v47 = vpop.f32.mrf.mxu0  ;;  %v677_v32 = vmax.f32 %v1499_v41, 0.0  ;;  %vm693_vm8 = vcmp.ne.f32.partialorder %v1499_v41, %v1499_v41 }
 0x27d   : > { %1206 = vpow2.f32 %v758_v43  ;;  %v754_v48 = vmul.f32 1.442695, %v738_v44  ;;  %v741_v49 = vsub.f32 0.0, %v725_v46  ;;  %v723_v50 = vand.u32 2147483647, %v1502_v45 }
 0x27e   : > { %v1507_v51 = vadd.f32 %v1188_v47, %v1488_v33  ;;  %v622_v52 = vpop.f32.mrf.mxu0  ;;  %v675_v38 = vmax.f32 %v1502_v45, 0.0  ;;  %vm691_vm11 = vcmp.ne.f32.partialorder %v1502_v45, %v1502_v45 }
 0x27f   : > { %1208 = vpow2.f32 %v754_v48  ;;  %v1510_v53 = vadd.f32 %v1488_v33, %v622_v52  ;;  %v760_v54 = vmul.f32 1.442695, %v741_v49  ;;  %v739_v55 = vsub.f32 0.0, %v723_v50 }
 0x280   : > { %v1189_v56 = vpop.f32.mrf.mxu0  ;;  %v728_v57 = vand.u32 2147483647, %v1507_v51  ;;  %v680_v44 = vmax.f32 %v1507_v51, 0.0  ;;  %vm696_vm14 = vcmp.ne.f32.partialorder %v1507_v51, %v1507_v51 }
 0x281   : > { %v726_v58 = vand.u32 2147483647, %v1510_v53  ;;  %1210 = vpow2.f32 %v760_v54  ;;  %v756_v59 = vmul.f32 1.442695, %v739_v55  ;;  %v1515_v60 = vadd.f32 %v1189_v56, %v1488_v33 }
 0x282   : > { %v625_v61 = vpop.f32.mrf.mxu0  ;;  %v744_v62 = vsub.f32 0.0, %v728_v57  ;;  %v678_v48 = vmax.f32 %v1510_v53, 0.0  ;;  %vm694_vm15 = vcmp.ne.f32.partialorder %v1510_v53, %v1510_v53 }
 0x283   : > { %v742_v63 = vsub.f32 0.0, %v726_v58  ;;  %v1518_v0 = vadd.f32 %v1488_v33, %v625_v61  ;;  %1212 = vpow2.f32 %v756_v59  ;;  %v729_v1 = vand.u32 2147483647, %v1515_v60 }
 0x284   : > { %v1192_v2 = vpop.f32.mrf.mxu0  ;;  %v766_v3 = vmul.f32 1.442695, %v744_v62  ;;  %v681_v52 = vmax.f32 %v1515_v60, 0.0  ;;  %vm697_vm0 = vcmp.ne.f32.partialorder %v1515_v60, %v1515_v60 }
 0x285   : > { %v762_v4 = vmul.f32 1.442695, %v742_v63  ;;  %v745_v5 = vsub.f32 0.0, %v729_v1  ;;  %v727_v7 = vand.u32 2147483647, %v1518_v0  ;;  %v1523_v8 = vadd.f32 %v1192_v2, %v1488_v33 }
 0x286   : > { %v638_v9 = vpop.f32.mrf.mxu0  ;;  %1214 = vpow2.f32 %v766_v3  ;;  %v679_v1 = vmax.f32 %v1518_v0, 0.0  ;;  %vm695_vm2 = vcmp.ne.f32.partialorder %v1518_v0, %v1518_v0 }
 0x287   : > { %v1526_v10 = vadd.f32 %v1488_v33, %v638_v9  ;;  %1216 = vpow2.f32 %v762_v4  ;;  %v768_v11 = vmul.f32 1.442695, %v745_v5  ;;  %v743_v12 = vsub.f32 0.0, %v727_v7 }
 0x288   : > { %v732_v13 = vand.u32 2147483647, %v1523_v8  ;;  %v1193_v16 = vpop.f32.mrf.mxu0 }
 0x289   : > { %1218 = vpow2.f32 %v768_v11  ;;  %v764_v15 = vmul.f32 1.442695, %v743_v12  ;;  %v730_v6 = vand.u32 2147483647, %v1526_v10  ;;  %v1531_v23 = vadd.f32 %v1193_v16, %v1488_v33 }
 0x28a   : > { %v1207_v14 = vpop.eup %1206  ;;  %v748_v19 = vsub.f32 0.0, %v732_v13  ;;  %v641_v40 = vpop.f32.mrf.mxu0 }
 0x28b   : > { %v804_v18 = vadd.f32 1.0, %v1207_v14  ;;  %1220 = vpow2.f32 %v764_v15  ;;  %v746_v21 = vsub.f32 0.0, %v730_v6  ;;  %v807_v28 = vmul.f32 -0.5, %v1207_v14 }
 0x28c   : > { %v1209_v20 = vpop.eup %1208  ;;  %v774_v25 = vmul.f32 1.442695, %v748_v19  ;;  %v733_v39 = vand.u32 2147483647, %v1531_v23  ;;  %v810_v42 = vand.u32 2147483647, %v1207_v14  ;;  %v1553_v54 = vadd.f32 %v1488_v33, %v641_v40  ;;  %v1196_v4 = vpop.f32.mrf.mxu0 }
 0x28d   : > { %1222 = vlog2.f32 %v804_v18  ;;  %v786_v22 = vadd.f32 1.0, %v1209_v20  ;;  %v770_v29 = vmul.f32 1.442695, %v746_v21  ;;  %v789_v36 = vmul.f32 -0.5, %v1209_v20 }
 0x28e   : > { %v1533_v26 = vpop.eup %1210  ;;  %v808_v46 = vadd.f32 1.0, %v807_v28  ;;  %v792_v47 = vand.u32 2147483647, %v1209_v20  ;;  %v749_v59 = vsub.f32 0.0, %v733_v39  ;;  %vm1558_vm3 = vcmp.lt.f32.partialorder %v810_v42, 0.0004427343 }
 0x28f   : > { %1224 = vlog2.f32 %v786_v22  ;;  %v813_v24 = vadd.f32 1.0, %v1533_v26  ;;  %v816_v50 = vmul.f32 -0.5, %v1533_v26  ;;  %v790_v56 = vadd.f32 1.0, %v789_v36 }
 0x290   : > { %v1541_v35 = vpop.eup %1212  ;;  %1226 = vpow2.f32 %v774_v25  ;;  %v809_v3 = vmul.f32 %v1207_v14, %v808_v46  ;;  %vm1568_vm5 = vcmp.lt.f32.partialorder %v792_v47, 0.0004427343  ;;  %v819_v5 = vand.u32 2147483647, %v1533_v26 }
 0x291   : > { %1228 = vlog2.f32 %v813_v24  ;;  %v795_v43 = vadd.f32 1.0, %v1541_v35  ;;  %v798_v57 = vmul.f32 -0.5, %v1541_v35  ;;  %v817_v7 = vadd.f32 1.0, %v816_v50 }
 0x292   : > { %1230 = vpow2.f32 %v770_v29  ;;  %v801_v9 = vand.u32 2147483647, %v1541_v35  ;;  %v731_v11 = vand.u32 2147483647, %v1553_v54  ;;  %v791_v13 = vmul.f32 %v1209_v20, %v790_v56 }
 0x293   : > { %v1215_v49 = vpop.eup %1214  ;;  %1232 = vlog2.f32 %v795_v43  ;;  %v799_v14 = vadd.f32 1.0, %v798_v57  ;;  %v776_v6 = vmul.f32 1.442695, %v749_v59  ;;  %vm1582_vm7 = vcmp.lt.f32.partialorder %v819_v5, 0.0004427343 }
 0x294   : > { %v1555_v55 = vpop.eup %1216  ;;  %v840_v58 = vadd.f32 1.0, %v1215_v49  ;;  %v843_v62 = vmul.f32 -0.5, %v1215_v49  ;;  %v846_v18 = vand.u32 2147483647, %v1215_v49  ;;  %v818_v29 = vmul.f32 %v1533_v26, %v817_v7 }
 0x295   : > { %v822_v63 = vadd.f32 1.0, %v1555_v55  ;;  %v825_v19 = vmul.f32 -0.5, %v1555_v55  ;;  %v828_v28 = vand.u32 2147483647, %v1555_v55  ;;  %vm1590_vm9 = vcmp.lt.f32.partialorder %v801_v9, 0.0004427343 }
 0x296   : > { %v1564_v2 = vpop.eup %1218  ;;  %1234 = vlog2.f32 %v840_v58  ;;  %v844_v17 = vadd.f32 1.0, %v843_v62  ;;  %v747_v36 = vsub.f32 0.0, %v731_v11  ;;  %v800_v42 = vmul.f32 %v1541_v35, %v799_v14 }
 0x297   : > { %1236 = vlog2.f32 %v822_v63  ;;  %v849_v15 = vadd.f32 1.0, %v1564_v2  ;;  %vm1611_vm12 = vcmp.lt.f32.partialorder %v846_v18, 0.0004427343  ;;  %v826_v50 = vadd.f32 1.0, %v825_v19 }
 0x298   : > { %v1575_v12 = vpop.eup %1220  ;;  %v845_v47 = vmul.f32 %v1215_v49, %v844_v17  ;;  %v772_v56 = vmul.f32 1.442695, %v747_v36  ;;  %vm1624_vm13 = vcmp.lt.f32.partialorder %v828_v28, 0.0004427343  ;;  %v852_v49 = vmul.f32 -0.5, %v1564_v2 }
 0x299   : > { %v831_v21 = vadd.f32 1.0, %v1575_v12  ;;  %1238 = vlog2.f32 %v849_v15  ;;  %v855_v58 = vand.u32 2147483647, %v1564_v2  ;;  %v834_v9 = vmul.f32 -0.5, %v1575_v12 }
 0x29a   : > { %v1223_v16 = vpop.eup %1222  ;;  %v837_v11 = vand.u32 2147483647, %v1575_v12  ;;  %v1662_v17 = vadd.f32 %v1196_v4, %v1488_v33 }
 0x29b   : > { %v806_v22 = vmul.f32 0.6931472, %v1223_v16  ;;  %1240 = vlog2.f32 %v831_v21  ;;  %v853_v16 = vadd.f32 1.0, %v852_v49  ;;  %v827_v21 = vmul.f32 %v1555_v55, %v826_v50 }
 0x29c   : > { %v1225_v20 = vpop.eup %1224  ;;  %1242 = vpow2.f32 %v776_v6  ;;  %vm1680_vm1 = vcmp.lt.f32.partialorder %v855_v58, 0.0004427343 }
 0x29d   : > { %v812_v39 = vsel %vm1558_vm3, %v809_v3, %v806_v22  ;;  %v788_v40 = vmul.f32 0.6931472, %v1225_v20  ;;  %v1597_v43 = vpop.eup %1226  ;;  %1244 = vpow2.f32 %v772_v56  ;;  %v835_v20 = vadd.f32 1.0, %v834_v9 }
 0x29e   : > { %v932_v46 = vadd.f32 %v812_v39, %v676_v30  ;;  %v1229_v57 = vpop.eup %1228  ;;  %v876_v59 = vadd.f32 1.0, %v1597_v43  ;;  %v879_v22 = vmul.f32 -0.5, %v1597_v43  ;;  %vm1686_vm3 = vcmp.lt.f32.partialorder %v837_v11, 0.0004427343 }
 0x29f   : > { %v794_v27 = vsel %vm1568_vm5, %v791_v13, %v788_v40  ;;  %v1631_v61 = vpop.eup %1230  ;;  %v815_v3 = vmul.f32 0.6931472, %v1229_v57  ;;  %v854_v39 = vmul.f32 %v1564_v2, %v853_v16  ;;  %v736_v40 = vand.u32 2147483647, %v1662_v17 }
 0x2a0   : > { %v948_v62 = vsel %vm692_vm4, %v1491_v34, %v932_v46  ;;  %v930_v63 = vadd.f32 %v794_v27, %v674_v31  ;;  %v1233_v5 = vpop.eup %1232  ;;  %1246 = vlog2.f32 %v876_v59  ;;  %v880_v57 = vadd.f32 1.0, %v879_v22  ;;  %v654_v27 = vpop.f32.mrf.mxu0 }
 0x2a1   : > { %v964_v7 = vsel %vm1603_vm10, %v948_v62, %v1491_v34  ;;  %v821_v13 = vsel %vm1582_vm7, %v818_v29, %v815_v3  ;;  %v797_v14 = vmul.f32 0.6931472, %v1233_v5  ;;  %v858_v34 = vadd.f32 1.0, %v1631_v61 }
 0x2a2   : > { %980 = vst [vmem:[%s1620_s20 + $0x10] sm:$0xff] %v964_v7  ;;  %v946_v31 = vsel %vm690_vm6, %v1495_v37, %v930_v63  ;;  %v933_v6 = vadd.f32 %v821_v13, %v677_v32  ;;  %v836_v49 = vmul.f32 %v1575_v12, %v835_v20  ;;  %v752_v58 = vsub.f32 0.0, %v736_v40  ;;  %v1197_v9 = vpop.f32.mrf.mxu0 }
 0x2a3   : > { %v962_v15 = vsel %vm1603_vm10, %v946_v31, %v1495_v37  ;;  %v1235_v18 = vpop.eup %1234  ;;  %v803_v19 = vsel %vm1590_vm9, %v800_v42, %v797_v14  ;;  %1248 = vlog2.f32 %v858_v34  ;;  %v882_v30 = vand.u32 2147483647, %v1597_v43 }
 0x2a4   : > { %978 = vst [vmem:[%s1620_s20] sm:$0xff] %v962_v15  ;;  %v1237_v25 = vpop.eup %1236  ;;  %v949_v37 = vsel %vm693_vm8, %v1499_v41, %v933_v6  ;;  %v931_v32 = vadd.f32 %v803_v19, %v675_v38  ;;  %v842_v28 = vmul.f32 0.6931472, %v1235_v18  ;;  %v861_v62 = vmul.f32 -0.5, %v1631_v61 }
 0x2a5   : > { %v965_v55 = vsel %vm1603_vm10, %v949_v37, %v1499_v41  ;;  %v824_v29 = vmul.f32 0.6931472, %v1237_v25  ;;  %v881_v7 = vmul.f32 %v1597_v43, %v880_v57  ;;  %v782_v13 = vmul.f32 1.442695, %v752_v58  ;;  %v657_v37 = vpop.f32.mrf.mxu0 }
 0x2a6   : > { %981 = vst [vmem:[%s1620_s20 + $0x18] sm:$0xff] %v965_v55  ;;  %v947_v36 = vsel %vm691_vm11, %v1502_v45, %v931_v32  ;;  %v848_v41 = vsel %vm1611_vm12, %v845_v47, %v842_v28  ;;  %v1239_v42 = vpop.eup %1238  ;;  %v862_v14 = vadd.f32 1.0, %v861_v62  ;;  %v864_v34 = vand.u32 2147483647, %v1631_v61 }
 0x2a7   : > { %v963_v46 = vsel %vm1603_vm10, %v947_v36, %v1502_v45  ;;  %v936_v50 = vadd.f32 %v848_v41, %v680_v44  ;;  %v830_v56 = vsel %vm1624_vm13, %v827_v21, %v824_v29  ;;  %v851_v47 = vmul.f32 0.6931472, %v1239_v42 }
 0x2a8   : > { %v1241_v35 = vpop.eup %1240  ;;  %979 = vst [vmem:[%s1620_s20 + $0x8] sm:$0xff] %v963_v46  ;;  %v934_v2 = vadd.f32 %v830_v56, %v678_v48  ;;  %v1759_v18 = vadd.f32 %v1197_v9, %v1488_v33  ;;  %v684_v21 = vmax.f32 %v1523_v8, 0.0  ;;  %vm883_vm4 = vcmp.lt.f32.partialorder %v882_v30, 0.0004427343 }
 0x2a9   : > { %v1710_v59 = vpop.eup %1242  ;;  %v952_v45 = vsel %vm696_vm14, %v1507_v51, %v936_v50  ;;  %v833_v44 = vmul.f32 0.6931472, %v1241_v35  ;;  %v857_v63 = vsel %vm1680_vm1, %v854_v39, %v851_v47  ;;  %vm700_vm5 = vcmp.ne.f32.partialorder %v1523_v8, %v1523_v8 }
 0x2aa   : > { %v968_v48 = vsel %vm1603_vm10, %v952_v45, %v1507_v51  ;;  %v950_v12 = vsel %vm694_vm15, %v1510_v53, %v934_v2  ;;  %v885_v3 = vadd.f32 1.0, %v1710_v59  ;;  %v937_v5 = vadd.f32 %v857_v63, %v681_v52  ;;  %v1737_v11 = vpop.eup %1244 }
 0x2ab   : > { %984 = vst [vmem:[%s1620_s20 + $0x30] sm:$0xff] %v968_v48  ;;  %v966_v4 = vsel %vm1603_vm10, %v950_v12, %v1510_v53  ;;  %v839_v51 = vsel %vm1686_vm3, %v836_v49, %v833_v44  ;;  %v1743_v53 = vadd.f32 %v1488_v33, %v654_v27  ;;  %v867_v15 = vadd.f32 1.0, %v1737_v11 }
 0x2ac   : > { %982 = vst [vmem:[%s1620_s20 + $0x20] sm:$0xff] %v966_v4  ;;  %v935_v31 = vadd.f32 %v839_v51, %v679_v1  ;;  %1250 = vlog2.f32 %v885_v3  ;;  %v953_v43 = vsel %vm697_vm0, %v1515_v60, %v937_v5  ;;  %v682_v28 = vmax.f32 %v1526_v10, 0.0 }
 0x2ad   : > { %v1247_v52 = vpop.eup %1246  ;;  %v969_v1 = vsel %vm1603_vm10, %v953_v43, %v1515_v60  ;;  %1252 = vlog2.f32 %v867_v15  ;;  %v734_v25 = vand.u32 2147483647, %v1743_v53  ;;  %vm865_vm6 = vcmp.lt.f32.partialorder %v864_v34, 0.0004427343 }
 0x2ae   : > { %v951_v6 = vsel %vm695_vm2, %v1518_v0, %v935_v31  ;;  %v878_v16 = vmul.f32 0.6931472, %v1247_v52  ;;  %985 = vst [vmem:[%s1620_s20 + $0x38] sm:$0xff] %v969_v1  ;;  %1254 = vpow2.f32 %v782_v13  ;;  %v888_v55 = vmul.f32 -0.5, %v1710_v59 }
 0x2af   : > { %v967_v19 = vsel %vm1603_vm10, %v951_v6, %v1518_v0  ;;  %v863_v0 = vmul.f32 %v1631_v61, %v862_v14  ;;  %v750_v29 = vsub.f32 0.0, %v734_v25  ;;  %v737_v24 = vand.u32 2147483647, %v1759_v18 }
 0x2b0   : > { %v1249_v22 = vpop.eup %1248  ;;  %983 = vst [vmem:[%s1620_s20 + $0x28] sm:$0xff] %v967_v19  ;;  %v884_v60 = vsel %vm883_vm4, %v881_v7, %v878_v16  ;;  %v1776_v41 = vadd.f32 %v1488_v33, %v657_v37  ;;  %vm698_vm7 = vcmp.ne.f32.partialorder %v1526_v10, %v1526_v10  ;;  %v870_v46 = vmul.f32 -0.5, %v1737_v11 }
 0x2b1   : > { %v940_v32 = vadd.f32 %v884_v60, %v684_v21  ;;  %v860_v20 = vmul.f32 0.6931472, %v1249_v22  ;;  %v778_v42 = vmul.f32 1.442695, %v750_v29  ;;  %v753_v61 = vsub.f32 0.0, %v737_v24 }
 0x2b2   : > { %v735_v50 = vand.u32 2147483647, %v1776_v41  ;;  %v889_v33 = vadd.f32 1.0, %v888_v55  ;;  %v891_v27 = vand.u32 2147483647, %v1710_v59  ;;  %v871_v47 = vadd.f32 1.0, %v870_v46 }
 0x2b3   : > { %v956_v38 = vsel %vm700_vm5, %v1523_v8, %v940_v32  ;;  %v866_v36 = vsel %vm865_vm6, %v863_v0, %v860_v20  ;;  %1256 = vpow2.f32 %v778_v42  ;;  %v784_v57 = vmul.f32 1.442695, %v753_v61 }
 0x2b4   : > { %v972_v39 = vsel %vm1603_vm10, %v956_v38, %v1523_v8  ;;  %v938_v40 = vadd.f32 %v866_v36, %v682_v28  ;;  %v751_v35 = vsub.f32 0.0, %v735_v50  ;;  %v890_v45 = vmul.f32 %v1710_v59, %v889_v33 }
 0x2b5   : > { %988 = vst [vmem:[%s1620_s20 + $0x50] sm:$0xff] %v972_v39  ;;  %1258 = vpow2.f32 %v784_v57  ;;  %v873_v44 = vand.u32 2147483647, %v1737_v11  ;;  %v685_v30 = vmax.f32 %v1531_v23, 0.0  ;;  %vm892_vm8 = vcmp.lt.f32.partialorder %v891_v27, 0.0004427343 }
 0x2b6   : > { %v954_v56 = vsel %vm698_vm7, %v1526_v10, %v938_v40  ;;  %v780_v49 = vmul.f32 1.442695, %v751_v35  ;;  %v872_v3 = vmul.f32 %v1737_v11, %v871_v47  ;;  %vm701_vm9 = vcmp.ne.f32.partialorder %v1531_v23, %v1531_v23 }
 0x2b7   : > { %v970_v8 = vsel %vm1603_vm10, %v954_v56, %v1526_v10  ;;  %v683_v59 = vmax.f32 %v1553_v54, 0.0  ;;  %vm874_vm11 = vcmp.lt.f32.partialorder %v873_v44, 0.0004427343  ;;  %vm699_vm12 = vcmp.ne.f32.partialorder %v1553_v54, %v1553_v54 }
 0x2b8   : > { %986 = vst [vmem:[%s1620_s20 + $0x40] sm:$0xff] %v970_v8  ;;  %1260 = vpow2.f32 %v780_v49  ;;  %v688_v25 = vmax.f32 %v1662_v17, 0.0  ;;  %vm704_vm14 = vcmp.ne.f32.partialorder %v1662_v17, %v1662_v17  ;;  %v686_v42 = vmax.f32 %v1743_v53, 0.0 }
 0x2b9   : > { %v1251_v2 = vpop.eup %1250  ;;  %v689_v8 = vmax.f32 %v1759_v18, 0.0  ;;  %vm702_vm1 = vcmp.ne.f32.partialorder %v1743_v53, %v1743_v53  ;;  %vm705_vm2 = vcmp.ne.f32.partialorder %v1759_v18, %v1759_v18  ;;  %vm703_vm4 = vcmp.ne.f32.partialorder %v1776_v41, %v1776_v41 }
 0x2ba   : > { %v887_v58 = vmul.f32 0.6931472, %v1251_v2  ;;  %v1253_v62 = vpop.eup %1252 }
 0x2bb   : > { %v1255_v48 = vpop.eup %1254  ;;  %v869_v63 = vmul.f32 0.6931472, %v1253_v62 }
 0x2bc   : > { %v893_v10 = vsel %vm892_vm8, %v890_v45, %v887_v58  ;;  %v912_v4 = vadd.f32 1.0, %v1255_v48  ;;  %v915_v14 = vmul.f32 -0.5, %v1255_v48  ;;  %v918_v6 = vand.u32 2147483647, %v1255_v48 }
 0x2bd   : > { %v941_v12 = vadd.f32 %v893_v10, %v685_v30  ;;  %v875_v51 = vsel %vm874_vm11, %v872_v3, %v869_v63  ;;  %v687_v45 = vmax.f32 %v1776_v41, 0.0 }
 0x2be   : > { %v939_v9 = vadd.f32 %v875_v51, %v683_v59  ;;  %1262 = vlog2.f32 %v912_v4  ;;  %v916_v1 = vadd.f32 1.0, %v915_v14  ;;  %vm919_vm13 = vcmp.lt.f32.partialorder %v918_v6, 0.0004427343 }
 0x2bf   : > { %v957_v5 = vsel %vm701_vm9, %v1531_v23, %v941_v12 }
 0x2c0   : > { %v973_v7 = vsel %vm1603_vm10, %v957_v5, %v1531_v23  ;;  %v955_v11 = vsel %vm699_vm12, %v1553_v54, %v939_v9  ;;  %v1257_v31 = vpop.eup %1256  ;;  %v917_v22 = vmul.f32 %v1255_v48, %v916_v1 }
 0x2c1   : > { %989 = vst [vmem:[%s1620_s20 + $0x58] sm:$0xff] %v973_v7  ;;  %v971_v13 = vsel %vm1603_vm10, %v955_v11, %v1553_v54  ;;  %v894_v52 = vadd.f32 1.0, %v1257_v31  ;;  %v897_v16 = vmul.f32 -0.5, %v1257_v31  ;;  %v900_v28 = vand.u32 2147483647, %v1257_v31 }
 0x2c2   : > { %987 = vst [vmem:[%s1620_s20 + $0x48] sm:$0xff] %v971_v13  ;;  %v1259_v43 = vpop.eup %1258 }
 0x2c3   : > { %1264 = vlog2.f32 %v894_v52  ;;  %v921_v34 = vadd.f32 1.0, %v1259_v43  ;;  %v924_v60 = vmul.f32 -0.5, %v1259_v43  ;;  %v898_v37 = vadd.f32 1.0, %v897_v16 }
 0x2c4   : > { %v927_v24 = vand.u32 2147483647, %v1259_v43  ;;  %vm901_vm15 = vcmp.lt.f32.partialorder %v900_v28, 0.0004427343 }
 0x2c5   : > { %v1261_v23 = vpop.eup %1260  ;;  %1266 = vlog2.f32 %v921_v34  ;;  %v925_v0 = vadd.f32 1.0, %v924_v60  ;;  %v899_v39 = vmul.f32 %v1257_v31, %v898_v37 }
 0x2c6   : > { %v903_v15 = vadd.f32 1.0, %v1261_v23  ;;  %v906_v20 = vmul.f32 -0.5, %v1261_v23  ;;  %v909_v33 = vand.u32 2147483647, %v1261_v23  ;;  %vm928_vm0 = vcmp.lt.f32.partialorder %v927_v24, 0.0004427343 }
 0x2c7   : > { %v926_v56 = vmul.f32 %v1259_v43, %v925_v0 }
 0x2c8   : > { %1268 = vlog2.f32 %v903_v15  ;;  %v907_v61 = vadd.f32 1.0, %v906_v20  ;;  %vm910_vm3 = vcmp.lt.f32.partialorder %v909_v33, 0.0004427343 }
 0x2ca   : > { %v908_v49 = vmul.f32 %v1261_v23, %v907_v61 }
 0x2cb   : > { %v1263_v19 = vpop.eup %1262 }
 0x2cc   : > { %v914_v21 = vmul.f32 0.6931472, %v1263_v19 }
 0x2ce   : > { %v920_v54 = vsel %vm919_vm13, %v917_v22, %v914_v21 }
 0x2cf   : > { %v944_v32 = vadd.f32 %v920_v54, %v688_v25 }
 0x2d0   : > { %v1265_v55 = vpop.eup %1264 }
 0x2d1   : > { %v960_v29 = vsel %vm704_vm14, %v1662_v17, %v944_v32  ;;  %v896_v36 = vmul.f32 0.6931472, %v1265_v55 }
 0x2d2   : > { %v976_v38 = vsel %vm1603_vm10, %v960_v29, %v1662_v17  ;;  %v1267_v40 = vpop.eup %1266 }
 0x2d3   : > { %992 = vst [vmem:[%s1620_s20 + $0x70] sm:$0xff] %v976_v38  ;;  %v902_v46 = vsel %vm901_vm15, %v899_v39, %v896_v36  ;;  %v923_v50 = vmul.f32 0.6931472, %v1267_v40 }
 0x2d4   : > { %v942_v57 = vadd.f32 %v902_v46, %v686_v42 }
 0x2d5   : > { %v1269_v27 = vpop.eup %1268  ;;  %v929_v17 = vsel %vm928_vm0, %v926_v56, %v923_v50 }
 0x2d6   : > { %v958_v35 = vsel %vm702_vm1, %v1743_v53, %v942_v57  ;;  %v945_v2 = vadd.f32 %v929_v17, %v689_v8  ;;  %v905_v47 = vmul.f32 0.6931472, %v1269_v27 }
 0x2d7   : > { %v974_v58 = vsel %vm1603_vm10, %v958_v35, %v1743_v53 }
 0x2d8   : > { %990 = vst [vmem:[%s1620_s20 + $0x60] sm:$0xff] %v974_v58  ;;  %v961_v44 = vsel %vm705_vm2, %v1759_v18, %v945_v2  ;;  %v911_v30 = vsel %vm910_vm3, %v908_v49, %v905_v47 }
 0x2d9   : > { %v977_v62 = vsel %vm1603_vm10, %v961_v44, %v1759_v18  ;;  %v943_v10 = vadd.f32 %v911_v30, %v687_v45 }
 0x2da   : > { %993 = vst [vmem:[%s1620_s20 + $0x78] sm:$0xff] %v977_v62 }
 0x2db   : > { %v959_v53 = vsel %vm703_vm4, %v1776_v41, %v943_v10 }
 0x2dc   : > { %v975_v48 = vsel %vm1603_vm10, %v959_v53, %v1776_v41 }
 0x2dd   : > { %991 = vst [vmem:[%s1620_s20 + $0x68] sm:$0xff] %v975_v48 }
 0x2de PF: > { %s12_s9 = sadd.s32 1, %s1276_s9  }
 0x2df   : > { %p9_p4 = scmp.ge.s32.totalorder %s12_s9, 4  }
 0x2e1   :  { %11 = sbr.rel (!%p9_p4) target bundleno = 1 (0x1), region = 58 }

</bundles_post_ra>
